<compile_context>
chip_gen: v7x
topology: tpu7x:2x2x1
jax: 0.10.0
libtpu: 0.0.40
codegen_flags: <defaults>
</compile_context>

<pallas_src>
import jax
import jax.numpy as jnp
from jax.scipy.linalg import block_diag
from jax.experimental import pallas as pl
from jax.experimental.pallas import tpu as pltpu


def _combined_net_kernel(x_ref, w1_ref, w2_ref, b_ref, o_ref):
    """One batch element per grid step; all N ensemble members fused.

    x_ref : (C_in, HW)   f32   (batch dim squeezed by the BlockSpec)
    w1_ref: (C_in, Mp)   bf16  stacked, lane-padded 1x1-conv weights
    w2_ref: (Mp, Kp)     bf16  block-diagonal, lane-padded FC weights
    b_ref : (2, Bp)      f32   row 0 = conv biases, row 1 = FC biases (padded)
    o_ref : (1, Kp)      f32   one lane-dense output row
    """
    mp = w1_ref.shape[1]
    kp = o_ref.shape[1]
    hw = x_ref.shape[1]

    # 1x1 conv for all members at once on the MXU: (HW, C_in) @ (C_in, Mp).
    # The transpose is a tiny in-kernel relayout (C_in rows), done in f32.
    xt = jnp.transpose(x_ref[...], (1, 0)).astype(jnp.bfloat16)        # (HW, C_in)
    h = jnp.dot(xt, w1_ref[...], preferred_element_type=jnp.float32)    # (HW, Mp) f32
    h = jnp.maximum(h + b_ref[0:1, :mp], 0.0)                           # bias + ReLU (f32)

    # Global average pool: sublane sum over spatial positions, scaled in f32.
    g = jnp.sum(h, axis=0, keepdims=True) * (1.0 / hw)                  # (1, Mp) f32

    # Per-member FC as one block-diagonal matmul; lane-dense (1, Kp) store.
    out = jnp.dot(g.astype(jnp.bfloat16), w2_ref[...],
                  preferred_element_type=jnp.float32) + b_ref[1:2, :kp]
    o_ref[...] = out.astype(o_ref.dtype)


def _pad_to_lane(n, lane=128):
    return max(lane, pl.cdiv(n, lane) * lane)


@jax.jit
def combined_net_forward(x_nchw, w1, b1, w2, b2):
    """CombinedNet forward.

    x_nchw : (B, C_in, H, W)   float32
    w1     : (N, C_mid, C_in)  per-net 1x1 conv weights
    b1     : (N, C_mid)        per-net conv biases
    w2     : (N, C_mid, K)     per-net FC weights
    b2     : (N, K)            per-net FC biases
    returns: (B, N*K)  ==  torch.cat([net_n(x) for n in range(N)], dim=1)
    """
    N, C_mid, C_in = w1.shape
    K = w2.shape[-1]
    B, _, H, W = x_nchw.shape
    HW = H * W
    M, NK = N * C_mid, N * K
    Mp, Kp = _pad_to_lane(M), _pad_to_lane(NK)
    Bp = max(Mp, Kp)

    # Zero-copy view of NCHW: (B, C_in, H*W). No HBM transpose pass over x.
    x3 = x_nchw.reshape(B, C_in, HW)

    # Stacked conv weights (C_in, N*C_mid), n-major columns, padded to 128 lanes.
    w1s = jnp.transpose(w1, (2, 0, 1)).reshape(C_in, M)
    w1s = jnp.pad(w1s, ((0, 0), (0, Mp - M))).astype(jnp.bfloat16)

    # Block-diagonal FC weights (N*C_mid, N*K) -> padded (Mp, Kp). (Dense
    # block-diag is fine at N=3; switch to per-head dots once N grows.)
    w2bd = block_diag(*[w2[n] for n in range(N)])
    w2bd = jnp.pad(w2bd, ((0, Mp - M), (0, Kp - NK))).astype(jnp.bfloat16)

    # Both bias vectors packed into one (2, Bp) f32 input (fewer DMA inputs).
    biases = jnp.stack([jnp.pad(b1.reshape(M), (0, Bp - M)),
                        jnp.pad(b2.reshape(NK), (0, Bp - NK))]).astype(jnp.float32)

    out = pl.pallas_call(
        _combined_net_kernel,
        out_shape=jax.ShapeDtypeStruct((B, 1, Kp), jnp.float32),
        grid=(B,),
        in_specs=[
            pl.BlockSpec((None, C_in, HW), lambda b: (b, 0, 0)),   # per-batch x tile
            pl.BlockSpec((C_in, Mp), lambda b: (0, 0)),            # resident weights
            pl.BlockSpec((Mp, Kp), lambda b: (0, 0)),
            pl.BlockSpec((2, Bp), lambda b: (0, 0)),
        ],
        out_specs=pl.BlockSpec((None, 1, Kp), lambda b: (b, 0, 0)),
        compiler_params=pltpu.CompilerParams(
            dimension_semantics=("parallel",),   # megacore-shard batch on v7x
            # vmem_limit_bytes=...  # set explicitly once HW / B grow large
        ),
    )(x3, w1s, w2bd, biases)

    # (B, 1, Kp) -> (B, N*K)  ==  torch.cat([net_n(x) for n], dim=1)
    return out.reshape(B, Kp)[:, :NK]


def _reference_forward(x_nchw, w1, b1, w2, b2):
    """Pure-JAX f32 reference matching the PyTorch semantics."""
    outs = []
    for n in range(w1.shape[0]):
        h = jnp.einsum('bchw,mc->bmhw', x_nchw, w1[n]) + b1[n][None, :, None, None]
        h = jnp.maximum(h, 0.0)
        g = jnp.mean(h, axis=(2, 3))
        outs.append(g @ w2[n] + b2[n][None, :])
    return jnp.concatenate(outs, axis=1)


if __name__ == "__main__":
    # Small shapes consistent with the module's forward.
    B, C_in, H, W = 2, 4, 16, 16
    C_mid, K, N = 32, 8, 3            # N ensemble members (len(state_dicts))

    key = jax.random.PRNGKey(0)
    kx, kw1, kb1, kw2, kb2 = jax.random.split(key, 5)

    x = jax.random.normal(kx, (B, C_in, H, W), dtype=jnp.float32)
    w1 = jax.random.normal(kw1, (N, C_mid, C_in), dtype=jnp.float32) * 0.1
    b1 = jax.random.normal(kb1, (N, C_mid), dtype=jnp.float32) * 0.1
    w2 = jax.random.normal(kw2, (N, C_mid, K), dtype=jnp.float32) * 0.1
    b2 = jax.random.normal(kb2, (N, K), dtype=jnp.float32) * 0.1

    out = jax.block_until_ready(combined_net_forward(x, w1, b1, w2, b2))
    ref = jax.block_until_ready(_reference_forward(x, w1, b1, w2, b2))

    assert out.shape == (B, N * K), out.shape
    # bf16 matmul operands with f32 accumulation -> loosened tolerance vs f32 ref.
    err = jnp.max(jnp.abs(out - ref))
    assert jnp.allclose(out, ref, atol=1e-2, rtol=1e-2), f"max abs err {err}"
    print("KERNEL_OK")
</pallas_src>

<mosaic_0001>
module attributes {stable_mosaic.version = 11 : i64} {
  func.func @_combined_net_kernel(%arg0: i32, %arg1: memref<1x4x256xf32, #tpu.memory_space<vmem>>, %arg2: memref<4x128xbf16, #tpu.memory_space<vmem>>, %arg3: memref<128x128xbf16, #tpu.memory_space<vmem>>, %arg4: memref<2x128xf32, #tpu.memory_space<vmem>>, %arg5: memref<1x1x128xf32, #tpu.memory_space<vmem>>) attributes {dimension_semantics = [#tpu.dimension_semantics<parallel>], iteration_bounds = array<i64: 2>, scalar_prefetch = 0 : i64, scratch_operands = 0 : i64, tpu.core_type = #tpu.core_type<tc>, window_params = [{transform_indices = @transform_0, window_bounds = array<i64: 1, 4, 256>}, {pipeline_mode = #tpu.pipeline_mode<synchronous>, transform_indices = @transform_1, window_bounds = array<i64: 4, 128>}, {pipeline_mode = #tpu.pipeline_mode<synchronous>, transform_indices = @transform_2, window_bounds = array<i64: 128, 128>}, {pipeline_mode = #tpu.pipeline_mode<synchronous>, transform_indices = @transform_3, window_bounds = array<i64: 2, 128>}, {transform_indices = @transform_4, window_bounds = array<i64: 1, 1, 128>}]} {
    %c0 = arith.constant 0 : index
    %c0_0 = arith.constant 0 : index
    %c0_1 = arith.constant 0 : index
    %0 = vector.load %arg1[%c0, %c0_0, %c0_1] : memref<1x4x256xf32, #tpu.memory_space<vmem>>, vector<1x4x256xf32>
    %1 = vector.shape_cast %0 : vector<1x4x256xf32> to vector<4x256xf32>
    %2 = tpu.transpose %1, [1, 0] : vector<4x256xf32> -> vector<256x4xf32>
    %3 = arith.truncf %2 : vector<256x4xf32> to vector<256x4xbf16>
    %c0_2 = arith.constant 0 : index
    %c0_3 = arith.constant 0 : index
    %4 = vector.load %arg2[%c0_2, %c0_3] : memref<4x128xbf16, #tpu.memory_space<vmem>>, vector<4x128xbf16>
    %cst = arith.constant dense<0.000000e+00> : vector<256x128xf32>
    %5 = tpu.matmul %3, %4, %cst {dimension_numbers = #tpu.dot_dimension_numbers<[1], [0], [0], [1], [0, 0, 1, 1], [], []>} : vector<256x4xbf16>, vector<4x128xbf16>, vector<256x128xf32> -> vector<256x128xf32>
    %c0_4 = arith.constant 0 : index
    %c0_5 = arith.constant 0 : index
    %6 = vector.load %arg4[%c0_4, %c0_5] : memref<2x128xf32, #tpu.memory_space<vmem>>, vector<1x128xf32>
    %7 = vector.broadcast %6 : vector<1x128xf32> to vector<256x128xf32>
    %8 = arith.addf %5, %7 : vector<256x128xf32>
    %cst_6 = arith.constant 0.000000e+00 : f32
    %9 = vector.broadcast %cst_6 : f32 to vector<256x128xf32>
    %10 = arith.maximumf %8, %9 : vector<256x128xf32>
    %cst_7 = arith.constant dense<0.000000e+00> : vector<128xf32>
    %11 = vector.multi_reduction <add>, %10, %cst_7 [0] : vector<256x128xf32> to vector<128xf32>
    %12 = vector.shape_cast %11 : vector<128xf32> to vector<1x128xf32>
    %cst_8 = arith.constant 3.906250e-03 : f32
    %13 = vector.broadcast %cst_8 : f32 to vector<1x128xf32>
    %14 = arith.mulf %12, %13 : vector<1x128xf32>
    %15 = arith.truncf %14 : vector<1x128xf32> to vector<1x128xbf16>
    %c0_9 = arith.constant 0 : index
    %c0_10 = arith.constant 0 : index
    %16 = vector.load %arg3[%c0_9, %c0_10] : memref<128x128xbf16, #tpu.memory_space<vmem>>, vector<128x128xbf16>
    %cst_11 = arith.constant dense<0.000000e+00> : vector<1x128xf32>
    %17 = tpu.matmul %15, %16, %cst_11 {dimension_numbers = #tpu.dot_dimension_numbers<[1], [0], [0], [1], [0, 0, 1, 1], [], []>} : vector<1x128xbf16>, vector<128x128xbf16>, vector<1x128xf32> -> vector<1x128xf32>
    %c1 = arith.constant 1 : index
    %c0_12 = arith.constant 0 : index
    %18 = vector.load %arg4[%c1, %c0_12] : memref<2x128xf32, #tpu.memory_space<vmem>>, vector<1x128xf32>
    %19 = arith.addf %17, %18 : vector<1x128xf32>
    %c0_13 = arith.constant 0 : index
    %c0_14 = arith.constant 0 : index
    %c0_15 = arith.constant 0 : index
    %20 = vector.load %arg5[%c0_13, %c0_14, %c0_15] : memref<1x1x128xf32, #tpu.memory_space<vmem>>, vector<1x1x128xf32>
    %21 = vector.shape_cast %20 : vector<1x1x128xf32> to vector<1x128xf32>
    %22 = vector.shape_cast %19 : vector<1x128xf32> to vector<1x1x128xf32>
    tpu.vector_store %arg5[%c0_13, %c0_14, %c0_15], %22 {strides = array<i32>} : memref<1x1x128xf32, #tpu.memory_space<vmem>>, vector<1x1x128xf32>,
    return
  }
  func.func @transform_0(%arg0: i32) -> (i32, i32, i32) {
    %c0_i32 = arith.constant 0 : i32
    %c0_i32_0 = arith.constant 0 : i32
    %c0_i32_1 = arith.constant 0 : i32
    return %arg0, %c0_i32, %c0_i32_0 : i32, i32, i32
  }
  func.func @transform_1(%arg0: i32) -> (i32, i32) {
    %c0_i32 = arith.constant 0 : i32
    %c0_i32_0 = arith.constant 0 : i32
    %c0_i32_1 = arith.constant 0 : i32
    return %c0_i32, %c0_i32_0 : i32, i32
  }
  func.func @transform_2(%arg0: i32) -> (i32, i32) {
    %c0_i32 = arith.constant 0 : i32
    %c0_i32_0 = arith.constant 0 : i32
    %c0_i32_1 = arith.constant 0 : i32
    return %c0_i32, %c0_i32_0 : i32, i32
  }
  func.func @transform_3(%arg0: i32) -> (i32, i32) {
    %c0_i32 = arith.constant 0 : i32
    %c0_i32_0 = arith.constant 0 : i32
    %c0_i32_1 = arith.constant 0 : i32
    return %c0_i32, %c0_i32_0 : i32, i32
  }
  func.func @transform_4(%arg0: i32) -> (i32, i32, i32) {
    %c0_i32 = arith.constant 0 : i32
    %c0_i32_0 = arith.constant 0 : i32
    %c0_i32_1 = arith.constant 0 : i32
    return %arg0, %c0_i32, %c0_i32_0 : i32, i32, i32
  }
}

</mosaic_0001>

<bundles_post_ra>
// kernel: combined_net_forward.1
= control target key start
LH: loop header
LB: loop body
LE: loop exit
PB: predicated region body
PF: predicated region fallthrough
CT: control target
= control target key end

     0   :  { %9 = vsyncpa [#allocation3], 0  ;;  %s1186_s0 = inlined_call_operand.vmem [shape: f32[2,4,256], index: 0, kind: input, shape index: {}]   ;;  %s1187_s1 = inlined_call_operand.vmem [shape: bf16[4,128], index: 1, kind: input, shape index: {}]   ;;  %s1188_s2 = inlined_call_operand.vmem [shape: bf16[128,128], index: 2, kind: input, shape index: {}]   ;;  %s1189_s3 = inlined_call_operand.vmem [shape: f32[2,128], index: 3, kind: input, shape index: {}]   ;;  %s1190_s4 = inlined_call_operand.hbm [shape: f32[2,1,128], index: 4, kind: output, shape index: {}]  }
   0x1   :  { %11 = vsyncpa [#allocation3 + $0x1], 0  ;;  %s1003_s15 = smov 0   ;;  %s1005_s16 = smov 0  }
   0x2   :  { %s1007_s17 = smov 0   ;;  %s1009_s18 = smov 0  }
   0x3 LB: > { %s1024_s19 = sadd.s32 4294967295, %s973_s18   ;;  %s745_s20 = sadd.s32 4294967294, %s973_s18   ;;  %s973_s18 = sphi %s1009_s18, %s1196_s18   ;;  %s969_s17 = sphi %s1007_s17, %s1195_s17   ;;  %s965_s16 = sphi %s1005_s16, %s1194_s16   ;;  %s961_s15 = sphi %s1003_s15, %s1193_s15  }
   0x4   : > { %s1028_s21 = sadd.s32 1, %s973_s18   ;;  %s113_s22 = sadd.s32 1, %s969_s17 }
   0x5   : > { %s110_s23 = ssub.s32 %s973_s18, %s1028_s21  ;;  %p123_p0 = scmp.ne.s32.totalorder %s969_s17, %s965_s16 }
   0x6   : > { %p111_p1 = scmp.eq.s32.totalorder %s110_s23, 0  ;;  %p124_p2 = scmp.eq.s32.totalorder %s1024_s19, 1 }
   0x7   : > { %p129_p3 = scmp.ne.s32.totalorder %s965_s16, %s961_s15  ;;  %p130_p4 = scmp.eq.s32.totalorder %s745_s20, 1 }
   0x8   : > { %s1039_s24 = scalar_select %p111_p1, %s969_s17, %s113_s22  }
   0x9   : > { %p1041_p5 = por %p124_p2, %p123_p0  ;;  %p1045_p6 = por %p130_p4, %p129_p3 }
   0xa   : > { %p748_p7 = scmp.ge.s32.totalorder %s973_s18, 1  ;;  %p165_p8 = scmp.lt.s32.totalorder %s973_s18, 3 }
   0xc   : > { %p166_p9 = pnand %p748_p7, %p165_p8 }
   0xd   : > { %p190_p10 = scmp.lt.s32.totalorder (!%p166_p9), %s1024_s19, 1  ;;  %v280_v1 = vld [vmem:[%s1187_s1] sm:$0x3] (!%p166_p9)  ;;  %vm335_vm0 = vcmask (!%p166_p9), 1041408   ;;  %vm286_vm1 = vcmask (!%p166_p9), 31744   ;;  %v975_v53 = vmov (!%p166_p9), 0.0  }
   0xe   : > { %169 = sbr.rel (%p166_p9) target bundleno = 750 (0x2ee), region = 36  ;;  %860 = vmatprep.subr.msk.bf16.mxu0 (!%p166_p9), %vm335_vm0, %v280_v1  ;;  %v337_v2 = vsel (!%p166_p9), %vm335_vm0, %v280_v1, 0  ;;  %v903_v52 = vld [vmem:[%s1188_s2] sm:$0xff] (!%p166_p9)   ;;  %840 = vmatprep.subr.bf16.mxu1 (!%p166_p9), %v975_v53  ;;  %v904_v54 = vld [vmem:[%s1188_s2 + $0x8] sm:$0xff] (!%p166_p9)   ;;  %v905_v55 = vld [vmem:[%s1188_s2 + $0x10] sm:$0xff] (!%p166_p9)   ;;  %vm976_vm2 = vmmov (!%p166_p9), 0  }
   0xf   : > { %807 = vmatpush3.bf16.msra.mxu0 (!%p166_p9), %v337_v2  ;;  %841 = vmatpush3.bf16.msra.mxu1 (!%p166_p9), %v903_v52  ;;  %v906_v56 = vld [vmem:[%s1188_s2 + $0x18] sm:$0xff] (!%p166_p9)   ;;  %v907_v57 = vld [vmem:[%s1188_s2 + $0x20] sm:$0xff] (!%p166_p9)   ;;  %v908_v59 = vld [vmem:[%s1188_s2 + $0x28] sm:$0xff] (!%p166_p9)   ;;  %s188_s9 = sand.u32 (!%p166_p9), 1, %s965_s16   ;;  %s776_s12 = sshll.u32 (!%p166_p9), %s1024_s19, 4 }
  0x10   : > { %842 = vmatprep.subr.bf16.mxu1 (!%p166_p9), %v975_v53  ;;  %v1093_v58 = vld [vmem:[%s1189_s3] ss:$0 sm:$0xff] (!%p166_p9)  ;;  %856 = vmatprep.mubr.msk.bf16.mxu1 (!%p166_p9), %vm976_vm2, %v975_v53  ;;  %v909_v1 = vld [vmem:[%s1188_s2 + $0x30] sm:$0xff] (!%p166_p9)   ;;  %s189_s13 = scalar_lea.vmem (!%p166_p9), [#allocation2], %s188_s9  ;;  %s1144_s23 = scalar_lea.hbm (!%p166_p9), %s1190_s4, %s776_s12 }
  0x11   : > { %s690_s14 = sshll.u32 (!%p166_p9), %s189_s13, 4  ;;  %s1146_s14 = int_to_ptr.vmem [resolvable:$true] %s690_s14 }
  0x13   : > { %843 = vmatpush3.bf16.msra.mxu1 (!%p166_p9), %v904_v54 }
  0x14   : > { %844 = vmatprep.subr.bf16.mxu1 (!%p166_p9), %v975_v53 }
  0x15   : > { %s191_s27 = scalar_select %p190_p10, %s1024_s19, 1 }
  0x16   : > { %s911_s19 = scalar_lea.vmem %s1146_s14, 16 }
  0x17   : > { %s779_s28 = sshll.u32 %s191_s27, 3  ;;  %845 = vmatpush3.bf16.msra.mxu1 %v905_v55  ;;  %s678_s27 = scalar_lea.sflag [#allocation3], %s188_s9 }
  0x18   : > { %s194_s5 = scalar_lea.vmem %s1186_s0, %s779_s28  ;;  %846 = vmatprep.subr.bf16.mxu1 %v975_v53  ;;  %p912_p11 = scmp.ne.s32.totalorder %s1146_s14, %s911_s19 }
  0x19   : > { %v196_v0 = vld [vmem:[%s194_s5] sm:$0xff]  ;;  %s977_s28 = smov [#allocation2]  }
  0x1a   : > { %200 = vxpose.xlu0.b32.start.end [1/1] (short) %v196_v0, 128  ;;  %v198_v3 = vcombine.high %v196_v0, %v196_v0  ;;  %p913_p12 = pnand %p912_p11, %p1041_p5  ;;  %s915_s29 = sshll.u32 %s977_s28, 4  ;;  %s916_s29 = int_to_ptr.vmem [resolvable:$false] %s915_s29 }
  0x1b   : > { %847 = vmatpush3.bf16.msra.mxu1 %v906_v56  ;;  %s917_s30 = scalar_lea.vmem %s916_s29, 32  ;;  %p918_p0 = scmp.lt.s32.totalorder %s1146_s14, %s916_s29 }
  0x1c   : > { %848 = vmatprep.subr.bf16.mxu1 %v975_v53  ;;  %p914_p13 = pneg %p913_p12  ;;  %p919_p1 = scmp.lt.s32.totalorder %s917_s30, %s911_s19 }
  0x1e   : > { %p920_p2 = por %p919_p1, %p918_p0 }
  0x1f   : > { %849 = vmatpush3.bf16.msra.mxu1 %v907_v57 }
  0x20   : > { %850 = vmatprep.subr.bf16.mxu1 %v975_v53  ;;  %p921_p3 = pnand %p920_p2, %p914_p13 }
  0x23   : > { %851 = vmatpush3.bf16.msra.mxu1 %v908_v59 }
  0x24   : > { %852 = vmatprep.subr.bf16.mxu1 %v975_v53 }
  0x27   : > { %853 = vmatpush3.bf16.msra.mxu1 %v909_v1 }
  0x28   : > { %854 = vmatprep.subr.bf16.mxu1 %v975_v53 }
  0x57   : > { %232 = vxpose.xlu0.b32.start.end [1/1] (short) %v198_v3, 128 }
  0x9a   : > { %v216_v4 = vpop.trf.xlu0 }
  0x9e   : > { %v217_v5 = vpop.trf.xlu0 }
  0x9f   : > { %v264_v6 = vpack.c.bf16 %v217_v5, %v216_v4 }
  0xa1   : > { %808 = vmatprep.mubr.msk.bf16.mxu0 %vm286_vm1, %v264_v6 }
  0xa2   : > { %v218_v7 = vpop.trf.xlu0 }
  0xa6   : > { %v219_v8 = vpop.trf.xlu0 }
  0xa7   : > { %v265_v9 = vpack.c.bf16 %v219_v8, %v218_v7  ;;  %v910_v7 = vld [vmem:[%s1188_s2 + $0x38] sm:$0xff]  }
  0xa8   : > { %855 = vmatpush3.bf16.msra.mxu1 %v910_v7 }
  0xa9   : > { %809 = vmatmul.mubr.msk.bf16.vlgmr.msra.gmra.mrb[0].mxu0 %vm286_vm1, %v265_v9 }
  0xaa   : > { %v220_v10 = vpop.trf.xlu0 }
  0xae   : > { %v221_v11 = vpop.trf.xlu0 }
  0xaf   : > { %v266_v12 = vpack.c.bf16 %v221_v11, %v220_v10 }
  0xb1   : > { %812 = vmatprep.mubr.msk.bf16.mxu0 %vm286_vm1, %v266_v12 }
  0xb2   : > { %v222_v13 = vpop.trf.xlu0 }
  0xb6   : > { %v223_v14 = vpop.trf.xlu0 }
  0xb7   : > { %v267_v15 = vpack.c.bf16 %v223_v14, %v222_v13 }
  0xb9   : > { %813 = vmatmul.mubr.msk.bf16.gmra.mrb[4].mxu0 %vm286_vm1, %v267_v15 }
  0xba   : > { %v224_v16 = vpop.trf.xlu0 }
  0xbe   : > { %v225_v17 = vpop.trf.xlu0 }
  0xbf   : > { %v268_v18 = vpack.c.bf16 %v225_v17, %v224_v16 }
  0xc1   : > { %816 = vmatprep.mubr.msk.bf16.mxu0 %vm286_vm1, %v268_v18 }
  0xc2   : > { %v226_v19 = vpop.trf.xlu0 }
  0xc6   : > { %v227_v20 = vpop.trf.xlu0 }
  0xc7   : > { %v269_v21 = vpack.c.bf16 %v227_v20, %v226_v19 }
  0xc9   : > { %817 = vmatmul.mubr.msk.bf16.gmra.mrb[8].mxu0 %vm286_vm1, %v269_v21 }
  0xca   : > { %v228_v22 = vpop.trf.xlu0 }
  0xce   : > { %v229_v23 = vpop.trf.xlu0 }
  0xcf   : > { %v270_v24 = vpack.c.bf16 %v229_v23, %v228_v22 }
  0xd1   : > { %820 = vmatprep.mubr.msk.bf16.mxu0 %vm286_vm1, %v270_v24 }
  0xd2   : > { %v230_v25 = vpop.trf.xlu0 }
  0xd6   : > { %v231_v26 = vpop.trf.xlu0 }
  0xd7   : > { %v271_v27 = vpack.c.bf16 %v231_v26, %v230_v25 }
  0xd9   : > { %821 = vmatmul.mubr.msk.bf16.gmra.mrb[12].mxu0 %vm286_vm1, %v271_v27 }
  0xda   : > { %v248_v28 = vpop.trf.xlu0 }
  0xde   : > { %v249_v29 = vpop.trf.xlu0 }
  0xdf   : > { %v272_v30 = vpack.c.bf16 %v249_v29, %v248_v28 }
  0xe1   : > { %824 = vmatprep.mubr.msk.bf16.mxu0 %vm286_vm1, %v272_v30 }
  0xe2   : > { %v250_v31 = vpop.trf.xlu0 }
  0xe6   : > { %v251_v32 = vpop.trf.xlu0 }
  0xe7   : > { %v273_v33 = vpack.c.bf16 %v251_v32, %v250_v31 }
  0xe9   : > { %825 = vmatmul.mubr.msk.bf16.gmra.mrb[16].mxu0 %vm286_vm1, %v273_v33 }
  0xea   : > { %v252_v34 = vpop.trf.xlu0 }
  0xee   : > { %v253_v35 = vpop.trf.xlu0 }
  0xef   : > { %v274_v36 = vpack.c.bf16 %v253_v35, %v252_v34 }
  0xf1   : > { %828 = vmatprep.mubr.msk.bf16.mxu0 %vm286_vm1, %v274_v36 }
  0xf2   : > { %v254_v37 = vpop.trf.xlu0 }
  0xf6   : > { %v255_v38 = vpop.trf.xlu0 }
  0xf7   : > { %v275_v39 = vpack.c.bf16 %v255_v38, %v254_v37 }
  0xf9   : > { %829 = vmatmul.mubr.msk.bf16.gmra.mrb[20].mxu0 %vm286_vm1, %v275_v39 }
  0xfa   : > { %v256_v40 = vpop.trf.xlu0 }
  0xfe   : > { %v257_v41 = vpop.trf.xlu0 }
  0xff   : > { %v276_v42 = vpack.c.bf16 %v257_v41, %v256_v40 }
 0x101   : > { %832 = vmatprep.mubr.msk.bf16.mxu0 %vm286_vm1, %v276_v42 }
 0x102   : > { %v258_v43 = vpop.trf.xlu0 }
 0x106   : > { %v259_v44 = vpop.trf.xlu0 }
 0x107   : > { %v277_v45 = vpack.c.bf16 %v259_v44, %v258_v43 }
 0x109   : > { %833 = vmatmul.mubr.msk.bf16.gmra.mrb[24].mxu0 %vm286_vm1, %v277_v45 }
 0x10a   : > { %v260_v46 = vpop.trf.xlu0 }
 0x10e   : > { %v261_v47 = vpop.trf.xlu0 }
 0x10f   : > { %v278_v48 = vpack.c.bf16 %v261_v47, %v260_v46 }
 0x111   : > { %836 = vmatprep.mubr.msk.bf16.mxu0 %vm286_vm1, %v278_v48 }
 0x112   : > { %v262_v49 = vpop.trf.xlu0 }
 0x116   : > { %v263_v50 = vpop.trf.xlu0 }
 0x117   : > { %v279_v51 = vpack.c.bf16 %v263_v50, %v262_v49 }
 0x119   : > { %837 = vmatmul.mubr.msk.bf16.gmra.mrb[28].mxu0 %vm286_vm1, %v279_v51 }
 0x17c   : > { %v810_v60 = vpop.f32.mrb[0].mxu0 }
 0x17d   : > { %v373_v61 = vpop.f32.mrb[1].mxu0  ;;  %v382_v2 = vadd.f32 %v810_v60, %v1093_v58 }
 0x17e   : > { %v374_v62 = vadd.f32 %v1093_v58, %v373_v61  ;;  %v811_v63 = vpop.f32.mrb[2].mxu0 }
 0x17f   : > { %v376_v0 = vpop.f32.mrb[3].mxu0  ;;  %v385_v5 = vadd.f32 %v811_v63, %v1093_v58  ;;  %v502_v8 = vmax.f32 %v382_v2, 0.0 }
 0x180   : > { %v377_v3 = vadd.f32 %v1093_v58, %v376_v0  ;;  %v500_v4 = vmax.f32 %v374_v62, 0.0 }
 0x181   : > { %v503_v10 = vmax.f32 %v385_v5, 0.0 }
 0x182   : > { %v501_v6 = vmax.f32 %v377_v3, 0.0 }
 0x184   : > { %v532_v9 = vadd.f32 %v501_v6, %v500_v4 }
 0x186   : > { %v533_v11 = vadd.f32 %v532_v9, %v502_v8 }
 0x188   : > { %v534_v12 = vadd.f32 %v533_v11, %v503_v10 }
 0x18c   : > { %v814_v13 = vpop.f32.mrb[4].mxu0 }
 0x18d   : > { %v389_v14 = vpop.f32.mrb[5].mxu0  ;;  %v398_v18 = vadd.f32 %v814_v13, %v1093_v58 }
 0x18e   : > { %v390_v15 = vadd.f32 %v1093_v58, %v389_v14  ;;  %v815_v16 = vpop.f32.mrb[6].mxu0 }
 0x18f   : > { %v392_v17 = vpop.f32.mrb[7].mxu0  ;;  %v401_v22 = vadd.f32 %v815_v16, %v1093_v58  ;;  %v506_v24 = vmax.f32 %v398_v18, 0.0 }
 0x190   : > { %v504_v19 = vmax.f32 %v390_v15, 0.0  ;;  %v393_v20 = vadd.f32 %v1093_v58, %v392_v17 }
 0x191   : > { %v507_v26 = vmax.f32 %v401_v22, 0.0 }
 0x192   : > { %v535_v21 = vadd.f32 %v534_v12, %v504_v19  ;;  %v505_v23 = vmax.f32 %v393_v20, 0.0 }
 0x194   : > { %v536_v25 = vadd.f32 %v535_v21, %v505_v23 }
 0x196   : > { %v537_v27 = vadd.f32 %v536_v25, %v506_v24 }
 0x198   : > { %v538_v28 = vadd.f32 %v537_v27, %v507_v26 }
 0x19c   : > { %v818_v29 = vpop.f32.mrb[8].mxu0 }
 0x19d   : > { %v405_v30 = vpop.f32.mrb[9].mxu0  ;;  %v414_v34 = vadd.f32 %v818_v29, %v1093_v58 }
 0x19e   : > { %v406_v31 = vadd.f32 %v1093_v58, %v405_v30  ;;  %v819_v32 = vpop.f32.mrb[10].mxu0 }
 0x19f   : > { %v408_v33 = vpop.f32.mrb[11].mxu0  ;;  %v417_v38 = vadd.f32 %v819_v32, %v1093_v58  ;;  %v510_v40 = vmax.f32 %v414_v34, 0.0 }
 0x1a0   : > { %v508_v35 = vmax.f32 %v406_v31, 0.0  ;;  %v409_v36 = vadd.f32 %v1093_v58, %v408_v33 }
 0x1a1   : > { %v511_v42 = vmax.f32 %v417_v38, 0.0 }
 0x1a2   : > { %v539_v37 = vadd.f32 %v538_v28, %v508_v35  ;;  %v509_v39 = vmax.f32 %v409_v36, 0.0 }
 0x1a4   : > { %v540_v41 = vadd.f32 %v539_v37, %v509_v39 }
 0x1a6   : > { %v541_v43 = vadd.f32 %v540_v41, %v510_v40 }
 0x1a8   : > { %v542_v44 = vadd.f32 %v541_v43, %v511_v42 }
 0x1ac   : > { %v822_v45 = vpop.f32.mrb[12].mxu0 }
 0x1ad   : > { %v421_v46 = vpop.f32.mrb[13].mxu0  ;;  %v430_v50 = vadd.f32 %v822_v45, %v1093_v58 }
 0x1ae   : > { %v422_v47 = vadd.f32 %v1093_v58, %v421_v46  ;;  %v823_v48 = vpop.f32.mrb[14].mxu0 }
 0x1af   : > { %v424_v49 = vpop.f32.mrb[15].mxu0  ;;  %v433_v54 = vadd.f32 %v823_v48, %v1093_v58  ;;  %v514_v56 = vmax.f32 %v430_v50, 0.0 }
 0x1b0   : > { %v512_v51 = vmax.f32 %v422_v47, 0.0  ;;  %v425_v52 = vadd.f32 %v1093_v58, %v424_v49 }
 0x1b1   : > { %v515_v59 = vmax.f32 %v433_v54, 0.0 }
 0x1b2   : > { %v543_v53 = vadd.f32 %v542_v44, %v512_v51  ;;  %v513_v55 = vmax.f32 %v425_v52, 0.0 }
 0x1b4   : > { %v544_v57 = vadd.f32 %v543_v53, %v513_v55 }
 0x1b6   : > { %v545_v60 = vadd.f32 %v544_v57, %v514_v56 }
 0x1b8   : > { %v546_v61 = vadd.f32 %v545_v60, %v515_v59 }
 0x1bc   : > { %v826_v62 = vpop.f32.mrb[16].mxu0 }
 0x1bd   : > { %v437_v63 = vpop.f32.mrb[17].mxu0  ;;  %v446_v3 = vadd.f32 %v826_v62, %v1093_v58 }
 0x1be   : > { %v438_v0 = vadd.f32 %v1093_v58, %v437_v63  ;;  %v827_v1 = vpop.f32.mrb[18].mxu0 }
 0x1bf   : > { %v440_v2 = vpop.f32.mrb[19].mxu0  ;;  %v449_v7 = vadd.f32 %v827_v1, %v1093_v58  ;;  %v518_v9 = vmax.f32 %v446_v3, 0.0 }
 0x1c0   : > { %v516_v4 = vmax.f32 %v438_v0, 0.0  ;;  %v441_v5 = vadd.f32 %v1093_v58, %v440_v2 }
 0x1c1   : > { %v519_v11 = vmax.f32 %v449_v7, 0.0 }
 0x1c2   : > { %v547_v6 = vadd.f32 %v546_v61, %v516_v4  ;;  %v517_v8 = vmax.f32 %v441_v5, 0.0 }
 0x1c4   : > { %v548_v10 = vadd.f32 %v547_v6, %v517_v8 }
 0x1c6   : > { %v549_v12 = vadd.f32 %v548_v10, %v518_v9 }
 0x1c8   : > { %v550_v13 = vadd.f32 %v549_v12, %v519_v11 }
 0x1cc   : > { %v830_v14 = vpop.f32.mrb[20].mxu0 }
 0x1cd   : > { %v453_v15 = vpop.f32.mrb[21].mxu0  ;;  %v462_v19 = vadd.f32 %v830_v14, %v1093_v58 }
 0x1ce   : > { %v454_v16 = vadd.f32 %v1093_v58, %v453_v15  ;;  %v831_v17 = vpop.f32.mrb[22].mxu0 }
 0x1cf   : > { %v456_v18 = vpop.f32.mrb[23].mxu0  ;;  %v465_v23 = vadd.f32 %v831_v17, %v1093_v58  ;;  %v522_v25 = vmax.f32 %v462_v19, 0.0 }
 0x1d0   : > { %v520_v20 = vmax.f32 %v454_v16, 0.0  ;;  %v457_v21 = vadd.f32 %v1093_v58, %v456_v18 }
 0x1d1   : > { %v523_v27 = vmax.f32 %v465_v23, 0.0 }
 0x1d2   : > { %v551_v22 = vadd.f32 %v550_v13, %v520_v20  ;;  %v521_v24 = vmax.f32 %v457_v21, 0.0 }
 0x1d4   : > { %v552_v26 = vadd.f32 %v551_v22, %v521_v24 }
 0x1d6   : > { %v553_v28 = vadd.f32 %v552_v26, %v522_v25 }
 0x1d8   : > { %v554_v29 = vadd.f32 %v553_v28, %v523_v27 }
 0x1dc   : > { %v834_v30 = vpop.f32.mrb[24].mxu0 }
 0x1dd   : > { %v469_v31 = vpop.f32.mrb[25].mxu0  ;;  %v478_v35 = vadd.f32 %v834_v30, %v1093_v58 }
 0x1de   : > { %v470_v32 = vadd.f32 %v1093_v58, %v469_v31  ;;  %v835_v33 = vpop.f32.mrb[26].mxu0 }
 0x1df   : > { %v472_v34 = vpop.f32.mrb[27].mxu0  ;;  %v481_v39 = vadd.f32 %v835_v33, %v1093_v58  ;;  %v526_v41 = vmax.f32 %v478_v35, 0.0 }
 0x1e0   : > { %v524_v36 = vmax.f32 %v470_v32, 0.0  ;;  %v473_v37 = vadd.f32 %v1093_v58, %v472_v34 }
 0x1e1   : > { %v527_v43 = vmax.f32 %v481_v39, 0.0 }
 0x1e2   : > { %v555_v38 = vadd.f32 %v554_v29, %v524_v36  ;;  %v525_v40 = vmax.f32 %v473_v37, 0.0 }
 0x1e4   : > { %v556_v42 = vadd.f32 %v555_v38, %v525_v40 }
 0x1e6   : > { %v557_v44 = vadd.f32 %v556_v42, %v526_v41 }
 0x1e8   : > { %v558_v45 = vadd.f32 %v557_v44, %v527_v43 }
 0x1ec   : > { %v838_v46 = vpop.f32.mrb[28].mxu0 }
 0x1ed   : > { %v485_v47 = vpop.f32.mrb[29].mxu0  ;;  %v494_v51 = vadd.f32 %v838_v46, %v1093_v58 }
 0x1ee   : > { %v486_v48 = vadd.f32 %v1093_v58, %v485_v47  ;;  %v839_v49 = vpop.f32.mrb[30].mxu0 }
 0x1ef   : > { %v488_v50 = vpop.f32.mrb[31].mxu0  ;;  %v497_v55 = vadd.f32 %v839_v49, %v1093_v58  ;;  %v530_v57 = vmax.f32 %v494_v51, 0.0 }
 0x1f0   : > { %v528_v52 = vmax.f32 %v486_v48, 0.0  ;;  %v489_v53 = vadd.f32 %v1093_v58, %v488_v50  ;;  %v587_v58 = vld [vmem:[%s1189_s3 + $0x1] sm:$0x1] }
 0x1f1   : > { %v531_v60 = vmax.f32 %v497_v55, 0.0 }
 0x1f2   : > { %v559_v54 = vadd.f32 %v558_v45, %v528_v52  ;;  %v529_v56 = vmax.f32 %v489_v53, 0.0 }
 0x1f4   : > { %v560_v59 = vadd.f32 %v559_v54, %v529_v56 }
 0x1f6   : > { %v561_v61 = vadd.f32 %v560_v59, %v530_v57 }
 0x1f8   : > { %v562_v62 = vadd.f32 %v561_v61, %v531_v60 }
 0x1fa   : > { %v563_v63 = vrot.slane %v562_v62, 4 }
 0x1fc   : > { %v564_v0 = vadd.f32 %v563_v63, %v562_v62 }
 0x1fe   : > { %v565_v1 = vrot.slane %v564_v0, 2 }
 0x200   : > { %v566_v2 = vadd.f32 %v565_v1, %v564_v0 }
 0x202   : > { %v567_v3 = vrot.slane %v566_v2, 1 }
 0x204   : > { %v568_v4 = vadd.f32 %v567_v3, %v566_v2 }
 0x206   : > { %v569_v5 = vmul.f32 0.00390625, %v568_v4 }
 0x208   : > { %v570_v6 = vpack.c.bf16 %v569_v5, %v569_v5 }
 0x20a   : > { %857 = vmatmul.mubr.bf16.vlgmr.msra.gmra.mrb[0].mxu1 %v570_v6 }
 0x2dd   : > { %v670_v7 = vpop.f32.mrb[0].mxu1 }
 0x2de   : > { %v671_v8 = vadd.f32 %v670_v7, %v587_v58  ;;  %v858_v9 = vpop.f32.mrb[1].mxu1 }
 0x2df   : > { %v673_v10 = vpop.f32.mrb[2].mxu1 }
 0x2e0   : > { %676 = vst [vmem:[%s189_s13] sm:$0x1] %v671_v8  ;;  %v859_v11 = vpop.f32.mrb[3].mxu1 }
 0x2e1   : > { %924 = shalt.err (!%p921_p3)
}
 0x2e2   : > { %s925_s5 = scalar_lea.hbm %s1144_s23, 16  ;;  %s929_s8 = scalar_lea.hbm %s1190_s4, 32 }
 0x2e3   : > { %p926_p4 = scmp.ne.s32.totalorder %s1144_s23, %s925_s5  ;;  %p930_p9 = scmp.lt.u32.totalorder %s1144_s23, %s1190_s4 }
 0x2e4   : > { %p931_p10 = scmp.lt.u32.totalorder %s929_s8, %s925_s5  ;;  %p933_p12 = scmp.lt.u32.totalorder %s925_s5, %s1144_s23 }
 0x2e5   : > { %p927_p7 = pnand %p926_p4, %p1041_p5 }
 0x2e6   : > { %p932_p11 = por %p931_p10, %p930_p9 }
 0x2e7   : > { %p928_p8 = pneg %p927_p7 }
 0x2e8   : > { %p934_p13 = por %p933_p12, %p932_p11 }
 0x2ea   : > { %p935_p0 = pnand %p934_p13, %p928_p8 }
 0x2ec   : > { %938 = shalt.err (!%p935_p0)
}
 0x2ed   : > { %861 = dma.vmem_to_hbm [thread:$0]  (%p1041_p5), %s1146_s14, 16, %s1144_s23, %s678_s27  }
 0x2ee PF: > { %p867_p1 = scmp.ge.s32.totalorder %s973_s18, 2  ;;  %s702_s11 = sand.u32 1, %s961_s15  }
 0x2ef   : > { %s703_s12 = scalar_lea.sflag [#allocation3], %s702_s11 }
 0x2f0   : > { %p864_p2 = pnand %p867_p1, %p1045_p6 }
 0x2f2   : > { %956 = dma.done.wait (!%p864_p2), %s703_s12, 16  }
 0x2f3   : > { %958 = vsyncadd (!%p864_p2), %s703_s12, 4294967280  ;;  %p14_p3 = scmp.ge.s32.totalorder %s1028_s21, 4   ;;  %s1193_s15 = smov %s965_s16 }
 0x2f4   : > { %s1194_s16 = smov %s969_s17  ;;  %s1195_s17 = smov %s1039_s24 }
 0x2f5   : > { %s1196_s18 = smov %s1028_s21  ;;  %16 = sbr.rel (!%p14_p3) target bundleno = 3 (0x3), region = 71 }
 0x2fc   :  { %707 = vsyncpa [#allocation3], 1 }
 0x2fd   :  { %709 = vsyncpa [#allocation3 + $0x1], 1 }

</bundles_post_ra>
